<compile_context>
chip_gen: v7x
topology: tpu7x:2x2x1
jax: 0.10.0
libtpu: 0.0.40
codegen_flags: <defaults>
</compile_context>

<pallas_src>
import math

import jax
import jax.numpy as jnp
from jax.experimental import pallas as pl
from jax.experimental.pallas import tpu as pltpu


def _round_up(a: int, b: int) -> int:
    return (a + b - 1) // b * b


def node_feat_kernel(x_ref, w1_ref, b1_ref, w2_ref, b2_ref, out_ref):
    # h = relu(x @ W1 + b1), bias-add + ReLU fused, all in f32 (safe on v5e).
    h = jnp.dot(x_ref[...], w1_ref[...], preferred_element_type=jnp.float32)
    h = jnp.maximum(h + b1_ref[...].astype(jnp.float32), 0.0)
    # out = h @ W2 + b2 (cast intermediate to the storage dtype for the MXU).
    o = jnp.dot(h.astype(w2_ref.dtype), w2_ref[...],
                preferred_element_type=jnp.float32)
    o = o + b2_ref[...].astype(jnp.float32)
    out_ref[...] = o.astype(out_ref.dtype)


def node_feat_process(x, w1_t, b1, w2_t, b2, *, tile_m: int = 1024):
    """x: [N, dim1]; w1_t: [dim1, dim3]; b1: [1, dim3]; w2_t: [dim3, dim4]; b2: [1, dim4]."""
    n, dim1 = x.shape
    dim3 = w1_t.shape[1]
    dim4 = w2_t.shape[1]
    itemsize = x.dtype.itemsize

    # Row-tile alignment: 8 sublanes for 32-bit, 16 for bf16, 32 for 8-bit.
    sublane = 8 * (4 // itemsize)
    tile_m = max(sublane, min(tile_m, _round_up(n, sublane)))
    tile_m = _round_up(tile_m, sublane)

    # Pad N instead of shrinking the steady-state tile; slice the tail off after.
    n_pad = _round_up(n, tile_m)
    if n_pad != n:
        x = jnp.pad(x, ((0, n_pad - n), (0, 0)))
    grid = (n_pad // tile_m,)

    # Advisory cost for the XLA scheduler.
    flops = 2 * n_pad * (dim1 * dim3 + dim3 * dim4)
    bytes_accessed = (
        itemsize * n_pad * (dim1 + dim4)
        + w1_t.dtype.itemsize * dim1 * dim3
        + w2_t.dtype.itemsize * dim3 * dim4
        + b1.dtype.itemsize * dim3
        + b2.dtype.itemsize * dim4
    )
    cost = pl.CostEstimate(flops=flops, transcendentals=0,
                           bytes_accessed=bytes_accessed)

    # Explicit VMEM budget: double-buffered x/out tiles + resident params +
    # f32 intermediates, with margin; capped at v7x's 64 MiB physical VMEM.
    vmem_bytes = (
        2 * tile_m * (dim1 + dim4) * itemsize                       # in/out double-buffers
        + 2 * (dim1 * dim3 + dim3 * dim4 + dim3 + dim4) * itemsize  # weights/biases
        + tile_m * (dim3 + dim4) * 4                                # f32 h, o
        + (4 << 20)                                                 # margin
    )
    vmem_limit = int(min(64 << 20, max(vmem_bytes, 16 << 20)))

    out = pl.pallas_call(
        node_feat_kernel,
        out_shape=jax.ShapeDtypeStruct((n_pad, dim4), x.dtype),
        grid=grid,
        in_specs=[
            pl.BlockSpec((tile_m, dim1), lambda i: (i, 0)),   # streamed row tile
            pl.BlockSpec((dim1, dim3), lambda i: (0, 0)),     # resident W1
            pl.BlockSpec((1, dim3), lambda i: (0, 0)),        # resident b1
            pl.BlockSpec((dim3, dim4), lambda i: (0, 0)),     # resident W2
            pl.BlockSpec((1, dim4), lambda i: (0, 0)),        # resident b2
        ],
        out_specs=pl.BlockSpec((tile_m, dim4), lambda i: (i, 0)),
        compiler_params=pltpu.CompilerParams(
            dimension_semantics=("parallel",),
            vmem_limit_bytes=vmem_limit,
        ),
        cost_estimate=cost,
    )(x, w1_t, b1, w2_t, b2)

    return out[:n] if n_pad != n else out


def init_params(key, dim1, dim3, dim4, dtype=jnp.float32):
    """Deterministic init matching the PyTorch module's __init__:
    xavier_normal_ for weights, default PyTorch uniform for biases."""
    k1, k2, k3, k4 = jax.random.split(key, 4)

    def xavier_normal(k, fan_in, fan_out):
        std = math.sqrt(2.0 / (fan_in + fan_out))
        # PyTorch weight is (out, in); we store it transposed as (in, out).
        w = std * jax.random.normal(k, (fan_out, fan_in), dtype=dtype)
        return w.T

    w1_t = xavier_normal(k1, dim1, dim3)           # (dim1, dim3)
    w2_t = xavier_normal(k2, dim3, dim4)           # (dim3, dim4)
    b1_bound = 1.0 / math.sqrt(dim1)
    b2_bound = 1.0 / math.sqrt(dim3)
    b1 = jax.random.uniform(k3, (1, dim3), dtype=dtype,
                            minval=-b1_bound, maxval=b1_bound)
    b2 = jax.random.uniform(k4, (1, dim4), dtype=dtype,
                            minval=-b2_bound, maxval=b2_bound)
    return w1_t, b1, w2_t, b2


def reference(x, w1_t, b1, w2_t, b2):
    """Pure-JAX reference with the same cast/accumulation structure as the kernel."""
    h = jnp.dot(x, w1_t, preferred_element_type=jnp.float32)
    h = jnp.maximum(h + b1.astype(jnp.float32), 0.0)
    o = jnp.dot(h.astype(w2_t.dtype), w2_t, preferred_element_type=jnp.float32)
    o = o + b2.astype(jnp.float32)
    return o.astype(x.dtype)


if __name__ == "__main__":
    key = jax.random.PRNGKey(0)
    kx, kp = jax.random.split(key)

    # Small shapes; N intentionally not a multiple of the tile to exercise the
    # ragged-N padding path, and tile_m small enough to give a multi-step grid.
    N, dim1, dim3, dim4 = 20, 32, 64, 16
    x = jax.random.normal(kx, (N, dim1), dtype=jnp.float32)
    w1_t, b1, w2_t, b2 = init_params(kp, dim1, dim3, dim4)

    # f32 path.
    out = jax.block_until_ready(node_feat_process(x, w1_t, b1, w2_t, b2, tile_m=16))
    ref = reference(x, w1_t, b1, w2_t, b2)
    assert out.shape == (N, dim4)
    assert jnp.allclose(out, ref, atol=1e-5, rtol=1e-5)

    # bf16 storage path (halves HBM bytes; f32 accumulation kept in-kernel).
    xb, w1b, b1b, w2b, b2b = (a.astype(jnp.bfloat16)
                              for a in (x, w1_t, b1, w2_t, b2))
    out_bf = jax.block_until_ready(node_feat_process(xb, w1b, b1b, w2b, b2b, tile_m=16))
    ref_bf = reference(xb, w1b, b1b, w2b, b2b)
    assert out_bf.shape == (N, dim4)
    assert jnp.allclose(out_bf.astype(jnp.float32), ref_bf.astype(jnp.float32),
                        atol=3e-2, rtol=3e-2)

    print("KERNEL_OK")
</pallas_src>

<mosaic_0001>
module attributes {stable_mosaic.version = 11 : i64} {
  func.func @node_feat_kernel(%arg0: i32, %arg1: memref<16x32xf32, #tpu.memory_space<vmem>>, %arg2: memref<32x64xf32, #tpu.memory_space<vmem>>, %arg3: memref<1x64xf32, #tpu.memory_space<vmem>>, %arg4: memref<64x16xf32, #tpu.memory_space<vmem>>, %arg5: memref<1x16xf32, #tpu.memory_space<vmem>>, %arg6: memref<16x16xf32, #tpu.memory_space<vmem>>) attributes {dimension_semantics = [#tpu.dimension_semantics<parallel>], iteration_bounds = array<i64: 2>, scalar_prefetch = 0 : i64, scratch_operands = 0 : i64, tpu.core_type = #tpu.core_type<tc>, window_params = [{transform_indices = @transform_0, window_bounds = array<i64: 16, 32>}, {pipeline_mode = #tpu.pipeline_mode<synchronous>, transform_indices = @transform_1, window_bounds = array<i64: 32, 64>}, {pipeline_mode = #tpu.pipeline_mode<synchronous>, transform_indices = @transform_2, window_bounds = array<i64: 1, 64>}, {pipeline_mode = #tpu.pipeline_mode<synchronous>, transform_indices = @transform_3, window_bounds = array<i64: 64, 16>}, {pipeline_mode = #tpu.pipeline_mode<synchronous>, transform_indices = @transform_4, window_bounds = array<i64: 1, 16>}, {transform_indices = @transform_5, window_bounds = array<i64: 16, 16>}]} {
    %c0 = arith.constant 0 : index
    %c0_0 = arith.constant 0 : index
    %0 = vector.load %arg1[%c0, %c0_0] : memref<16x32xf32, #tpu.memory_space<vmem>>, vector<16x32xf32>
    %c0_1 = arith.constant 0 : index
    %c0_2 = arith.constant 0 : index
    %1 = vector.load %arg2[%c0_1, %c0_2] : memref<32x64xf32, #tpu.memory_space<vmem>>, vector<32x64xf32>
    %cst = arith.constant dense<0.000000e+00> : vector<16x64xf32>
    %2 = tpu.matmul %0, %1, %cst {dimension_numbers = #tpu.dot_dimension_numbers<[1], [0], [0], [1], [0, 0, 1, 1], [], []>} : vector<16x32xf32>, vector<32x64xf32>, vector<16x64xf32> -> vector<16x64xf32>
    %c0_3 = arith.constant 0 : index
    %c0_4 = arith.constant 0 : index
    %3 = vector.load %arg3[%c0_3, %c0_4] : memref<1x64xf32, #tpu.memory_space<vmem>>, vector<1x64xf32>
    %4 = vector.broadcast %3 : vector<1x64xf32> to vector<16x64xf32>
    %5 = arith.addf %2, %4 : vector<16x64xf32>
    %cst_5 = arith.constant 0.000000e+00 : f32
    %6 = vector.broadcast %cst_5 : f32 to vector<16x64xf32>
    %7 = arith.maximumf %5, %6 : vector<16x64xf32>
    %c0_6 = arith.constant 0 : index
    %c0_7 = arith.constant 0 : index
    %8 = vector.load %arg4[%c0_6, %c0_7] : memref<64x16xf32, #tpu.memory_space<vmem>>, vector<64x16xf32>
    %cst_8 = arith.constant dense<0.000000e+00> : vector<16x16xf32>
    %9 = tpu.matmul %7, %8, %cst_8 {dimension_numbers = #tpu.dot_dimension_numbers<[1], [0], [0], [1], [0, 0, 1, 1], [], []>} : vector<16x64xf32>, vector<64x16xf32>, vector<16x16xf32> -> vector<16x16xf32>
    %c0_9 = arith.constant 0 : index
    %c0_10 = arith.constant 0 : index
    %10 = vector.load %arg5[%c0_9, %c0_10] : memref<1x16xf32, #tpu.memory_space<vmem>>, vector<1x16xf32>
    %11 = vector.broadcast %10 : vector<1x16xf32> to vector<16x16xf32>
    %12 = arith.addf %9, %11 : vector<16x16xf32>
    %c0_11 = arith.constant 0 : index
    %c0_12 = arith.constant 0 : index
    %13 = vector.load %arg6[%c0_11, %c0_12] : memref<16x16xf32, #tpu.memory_space<vmem>>, vector<16x16xf32>
    tpu.vector_store %arg6[%c0_11, %c0_12], %12 {strides = array<i32>} : memref<16x16xf32, #tpu.memory_space<vmem>>, vector<16x16xf32>,
    return
  }
  func.func @transform_0(%arg0: i32) -> (i32, i32) {
    %c0_i32 = arith.constant 0 : i32
    %c0_i32_0 = arith.constant 0 : i32
    return %arg0, %c0_i32 : i32, i32
  }
  func.func @transform_1(%arg0: i32) -> (i32, i32) {
    %c0_i32 = arith.constant 0 : i32
    %c0_i32_0 = arith.constant 0 : i32
    %c0_i32_1 = arith.constant 0 : i32
    return %c0_i32, %c0_i32_0 : i32, i32
  }
  func.func @transform_2(%arg0: i32) -> (i32, i32) {
    %c0_i32 = arith.constant 0 : i32
    %c0_i32_0 = arith.constant 0 : i32
    %c0_i32_1 = arith.constant 0 : i32
    return %c0_i32, %c0_i32_0 : i32, i32
  }
  func.func @transform_3(%arg0: i32) -> (i32, i32) {
    %c0_i32 = arith.constant 0 : i32
    %c0_i32_0 = arith.constant 0 : i32
    %c0_i32_1 = arith.constant 0 : i32
    return %c0_i32, %c0_i32_0 : i32, i32
  }
  func.func @transform_4(%arg0: i32) -> (i32, i32) {
    %c0_i32 = arith.constant 0 : i32
    %c0_i32_0 = arith.constant 0 : i32
    %c0_i32_1 = arith.constant 0 : i32
    return %c0_i32, %c0_i32_0 : i32, i32
  }
  func.func @transform_5(%arg0: i32) -> (i32, i32) {
    %c0_i32 = arith.constant 0 : i32
    %c0_i32_0 = arith.constant 0 : i32
    return %arg0, %c0_i32 : i32, i32
  }
}

</mosaic_0001>

<bundles_post_ra>
// kernel: tpu_custom_call.1
= control target key start
LH: loop header
LB: loop body
LE: loop exit
PB: predicated region body
PF: predicated region fallthrough
CT: control target
= control target key end

     0   :  { %s614_s18 = smov 0   ;;  %s680_s0 = inlined_call_operand.vmem [shape: f32[32,32], index: 0, kind: input, shape index: {}]   ;;  %s681_s1 = inlined_call_operand.vmem [shape: f32[32,64], index: 1, kind: input, shape index: {}]   ;;  %s682_s2 = inlined_call_operand.vmem [shape: f32[1,64], index: 2, kind: input, shape index: {}]   ;;  %s683_s3 = inlined_call_operand.vmem [shape: f32[64,16], index: 3, kind: input, shape index: {}]   ;;  %s684_s4 = inlined_call_operand.vmem [shape: f32[1,16], index: 4, kind: input, shape index: {}]   ;;  %s685_s5 = inlined_call_operand.vmem [shape: f32[32,16], index: 5, kind: output, shape index: {}]  }
   0x1 LB: > { %s481_s19 = sadd.s32 4294967295, %s582_s18   ;;  %p485_p0 = scmp.ge.s32.totalorder %s582_s18, 1  ;;  %s582_s18 = sphi %s614_s18, %s15_s18  }
   0x2   : > { %p188_p1 = scmp.lt.s32.totalorder %s582_s18, 3 }
   0x4   : > { %p189_p2 = pnand %p485_p0, %p188_p1 }
   0x5   : > { %v230_v0 = vld [vmem:[%s681_s1] sm:$0xff] (!%p189_p2)  ;;  %v231_v1 = vld [vmem:[%s681_s1 + $0x8] sm:$0xff] (!%p189_p2)  ;;  %v232_v2 = vld [vmem:[%s681_s1 + $0x10] sm:$0xff] (!%p189_p2)  ;;  %s486_s26 = sshll.u32 (!%p189_p2), %s481_s19, 1  ;;  %vm241_vm0 = vcmask (!%p189_p2), 261120   ;;  %vm340_vm1 = vcmask (!%p189_p2), 523264  }
   0x6   : > { %192 = sbr.rel (%p189_p2) target bundleno = 452 (0x1c4), region = 40  ;;  %v544_v3 = vpack.c.bf16 (!%p189_p2), %v231_v1, %v230_v0  ;;  %v233_v4 = vld [vmem:[%s681_s1 + $0x18] sm:$0xff] (!%p189_p2)  ;;  %p217_p3 = scmp.lt.s32.totalorder (!%p189_p2), %s486_s26, 3  ;;  %v325_v5 = vld [vmem:[%s683_s3] sm:$0xff] (!%p189_p2)  ;;  %v326_v6 = vld [vmem:[%s683_s3 + $0x8] sm:$0xff] (!%p189_p2)  ;;  %vm422_vm2 = vcmask (!%p189_p2), 130048  }
   0x7   : > { %v548_v7 = vpack.c.bf16 (!%p189_p2), %v233_v4, %v232_v2  ;;  %v552_v8 = vpack.c.bf16 (!%p189_p2), %v326_v6, %v325_v5  ;;  %v327_v9 = vld [vmem:[%s683_s3 + $0x10] sm:$0xff] (!%p189_p2)  ;;  %v328_v10 = vld [vmem:[%s683_s3 + $0x18] sm:$0xff] (!%p189_p2)  ;;  %v329_v12 = vld [vmem:[%s683_s3 + $0x20] sm:$0xff] (!%p189_p2) }
   0x8   : > { %545 = vmatprep.subr.bf16.mxu0 (!%p189_p2), %v544_v3  ;;  %v556_v11 = vpack.c.bf16 (!%p189_p2), %v328_v10, %v327_v9  ;;  %v330_v13 = vld [vmem:[%s683_s3 + $0x28] sm:$0xff] (!%p189_p2)  ;;  %v331_v17 = vld [vmem:[%s683_s3 + $0x30] sm:$0xff] (!%p189_p2)  ;;  %v332_v18 = vld [vmem:[%s683_s3 + $0x38] sm:$0xff] (!%p189_p2) }
   0x9   : > { %547 = vmatpush3.bf16.msra.mxu0 (!%p189_p2), %v544_v3  ;;  %553 = vmatprep.subr.bf16.mxu1 (!%p189_p2), %v552_v8  ;;  %v560_v14 = vpack.c.bf16 (!%p189_p2), %v330_v13, %v329_v12  ;;  %v564_v19 = vpack.c.bf16 (!%p189_p2), %v332_v18, %v331_v17  ;;  %v490_v20 = vld [vmem:[%s682_s2] ss:$0 sm:$0xff] (!%p189_p2) }
   0xa   : > { %549 = vmatprep.subr.bf16.mxu0 (!%p189_p2), %v548_v7  ;;  %555 = vmatpush3.bf16.msra.mxu1 (!%p189_p2), %v552_v8  ;;  %v493_v27 = vld [vmem:[%s684_s4] ss:$0 sm:$0xff] (!%p189_p2) }
   0xb   : > { %557 = vmatprep.subr.bf16.mxu1 (!%p189_p2), %v556_v11 }
   0xd   : > { %s687_s26 = smov (!%p217_p3, %s486_s26), 3  ;;  %551 = vmatpush3.bf16.msra.mxu0 %v548_v7 }
   0xe   : > { %s487_s16 = sshll.u32 %s687_s26, 3  ;;  %559 = vmatpush3.bf16.msra.mxu1 %v556_v11 }
   0xf   : > { %s220_s20 = scalar_lea.vmem %s680_s0, %s487_s16  ;;  %561 = vmatprep.subr.bf16.mxu1 %v560_v14  ;;  %s226_s7 = scalar_lea.vmem %s685_s5, %s487_s16 }
  0x10   : > { %v228_v15 = vld [vmem:[%s220_s20] sm:$0xff]  ;;  %v229_v16 = vld [vmem:[%s220_s20 + $0x8] sm:$0xff] }
  0x11   : > { %522 = vmatprep.mubr.msk.f32.mxu0 %vm241_vm0, %v228_v15 }
  0x12   : > { %523 = vmatmul.mubr.msk.f32.vlgmr.msra.gmra.mrb[0].mxu0 %vm241_vm0, %v229_v16  ;;  %563 = vmatpush3.bf16.msra.mxu1 %v560_v14 }
  0x13   : > { %565 = vmatprep.subr.bf16.mxu1 %v564_v19 }
  0x16   : > { %567 = vmatpush3.bf16.msra.mxu1 %v564_v19 }
  0xe5   : > { %v524_v21 = vpop.f32.mrb[0].mxu0 }
  0xe6   : > { %v320_v22 = vadd.f32 %v524_v21, %v490_v20  ;;  %v314_v23 = vpop.f32.mrb[1].mxu0 }
  0xe7   : > { %v315_v24 = vadd.f32 %v490_v20, %v314_v23 }
  0xe8   : > { %v324_v26 = vmax.f32 %v320_v22, 0.0 }
  0xe9   : > { %v323_v25 = vmax.f32 %v315_v24, 0.0 }
  0xeb   : > { %541 = vmatprep.mubr.msk.f32.mxu1 %vm340_vm1, %v323_v25 }
  0xec   : > { %542 = vmatmul.mubr.msk.f32.vlgmr.msra.gmra.mrb[0].mxu1 %vm340_vm1, %v324_v26 }
 0x1bf   : > { %v543_v28 = vpop.f32.mrb[0].mxu1 }
 0x1c0   : > { %v413_v29 = vpop.f32.mrb[1].mxu1  ;;  %v419_v31 = vadd.f32 %v543_v28, %v493_v27 }
 0x1c1   : > { %v414_v30 = vadd.f32 %v493_v27, %v413_v29 }
 0x1c2   : > { %424 = vst.msk [vmem:[%s226_s7 + $0x8] sm:$0xff] %vm422_vm2, %v419_v31 }
 0x1c3   : > { %423 = vst.msk [vmem:[%s226_s7] sm:$0xff] %vm422_vm2, %v414_v30 }
 0x1c4 PF: > { %s15_s18 = sadd.s32 1, %s582_s18  }
 0x1c5   : > { %p12_p4 = scmp.ge.s32.totalorder %s15_s18, 4  }
 0x1c7   :  { %14 = sbr.rel (!%p12_p4) target bundleno = 1 (0x1), region = 70 }

</bundles_post_ra>
